<compile_context>
chip_gen: v7x
topology: tpu7x:2x2x1
jax: 0.10.0
libtpu: 0.0.40
codegen_flags: <defaults>
</compile_context>

<pallas_src>
import jax
import jax.numpy as jnp
from jax import lax
from jax.experimental import pallas as pl
from jax.experimental.pallas import tpu as pltpu

KS = 7    # spectral kernel size
OC = 24   # output channels of each conv branch


# ----------------------------- Pallas kernel --------------------------------
def _assa_kernel(p_ref, w_ref, b_ref, out_ref):
    # p_ref  : (1, 63, LT) bf16   im2col patches (taps on sublanes, L on lanes)
    # w_ref  : (48, 63)    bf16   folded [0.5*s3*W3 ; 0.5*s1*W1 (centre tap)]
    # b_ref  : (48, 1)     f32    folded [0.5*t3 ; 0.5*t1]
    # out_ref: (1, 24, LT) f32
    y = jnp.dot(w_ref[...], p_ref[0],
                preferred_element_type=jnp.float32)        # (48, LT), f32 acc
    y = jnp.maximum(y + b_ref[...], 0.0)                   # bias + ReLU
    # rows 0..23 = 0.5*relu(bn3(conv3x3)), rows 24..47 = 0.5*relu(bn1(conv1x1))
    out_ref[0] = y[:OC] + y[OC:]


# ------------------------------- wrapper -------------------------------------
def adaptive_spectral_spatial_attention(x, p, *,
                                        lane_tile=8192,        # mult of 128
                                        full_block_lanes=16384):
    """x: (N, W, H, C) f32.  p: parameter dict.  Returns (N, 24*C_out, H, W)."""
    N, W, H, C = x.shape
    C_out = (C - KS) // 2 + 1
    L = W * H * C_out
    eps = 1e-3

    # ---- fold conv bias + BN (inference) + the exact-0.5 attention weights ----
    s1 = p["g1"] / jnp.sqrt(p["rv1"] + eps)
    t1 = s1 * (p["b1"] - p["rm1"]) + p["bt1"]
    s3 = p["g3"] / jnp.sqrt(p["rv3"] + eps)
    t3 = s3 * (p["b3"] - p["rm3"]) + p["bt3"]

    w3m = p["w3"].reshape(OC, 9 * KS)                 # column order = (dw,dh,ks)
    w1m = p["w1"].reshape(OC, KS)
    # 1x1x7 branch reads only the centre tap (dw=1, dh=1) -> columns 28..34.
    w1_full = jnp.zeros((OC, 9 * KS), jnp.float32).at[:, 4 * KS:5 * KS].set(w1m)
    wc = jnp.concatenate([0.5 * s3[:, None] * w3m,
                          0.5 * s1[:, None] * w1_full], axis=0)       # (48, 63)
    bc = jnp.concatenate([0.5 * t3, 0.5 * t1]).astype(jnp.float32)[:, None]

    # ---- im2col staging in bf16 (static strided slices only, no gather) ------
    x16 = x.astype(jnp.bfloat16)                        # cast BEFORE the patch build
    xp = jnp.pad(x16, ((0, 0), (1, 1), (1, 1), (0, 0)))
    # channel unfold per spectral tap ks: channels ks, ks+2, ..., ks+2*(C_out-1)
    xs = [xp[:, :, :, ks:ks + 2 * C_out - 1:2] for ks in range(KS)]
    rows = []
    for dw in range(3):
        for dh in range(3):
            for ks in range(KS):
                rows.append(xs[ks][:, dw:dw + W, dh:dh + H, :].reshape(N, 1, L))
    p3 = jnp.concatenate(rows, axis=1)                  # (N, 63, L) bf16

    # ---- lane tiling: big tiles, avoid pad/slice passes whenever possible ----
    if L <= full_block_lanes:
        # one full-L tile per sample: no padding, largest possible step
        lt, n_t, l_pad = L, 1, L
    else:
        # try to tile L exactly with a multiple of 128 (no pad pass needed)
        lt = 0
        for m in range(min(lane_tile, L) // 128, 0, -1):
            if L % (m * 128) == 0:
                lt = m * 128
                break
        if lt:
            n_t, l_pad = L // lt, L
        else:
            lt = lane_tile
            n_t = pl.cdiv(L, lt)
            l_pad = n_t * lt
            p3 = jnp.pad(p3, ((0, 0), (0, 0), (0, l_pad - L)))

    out = pl.pallas_call(
        _assa_kernel,
        out_shape=jax.ShapeDtypeStruct((N, OC, l_pad), jnp.float32),
        grid=(N, n_t),
        in_specs=[
            pl.BlockSpec((1, 9 * KS, lt), lambda n, t: (n, 0, t)),
            pl.BlockSpec((2 * OC, 9 * KS), lambda n, t: (0, 0)),
            pl.BlockSpec((2 * OC, 1), lambda n, t: (0, 0)),
        ],
        out_specs=pl.BlockSpec((1, OC, lt), lambda n, t: (n, 0, t)),
        compiler_params=pltpu.CompilerParams(
            dimension_semantics=("parallel", "parallel")),
    )(p3, wc.astype(jnp.bfloat16), bc)

    if l_pad != L:
        out = out[:, :, :L]
    # (N, 24, L) with L = (iw, ih, c_out) row-major == torch's contiguous
    # (N, 24, W, H, C_out) memory order, so this reshape == .view(batch,-1,h,w).
    return out.reshape(N, -1, H, W)


# --------------------------- pure-JAX reference -------------------------------
def _bn_relu(y, g, bt, rm, rv, eps=1e-3):
    sh = (1, -1, 1, 1, 1)
    return jnp.maximum(
        g.reshape(sh) * (y - rm.reshape(sh)) / jnp.sqrt(rv.reshape(sh) + eps)
        + bt.reshape(sh), 0.0)


def reference_forward(x, p):
    N, W, H, C = x.shape
    x5 = x[:, None]                                                   # (N,1,W,H,C)
    dn = ("NCDHW", "OIDHW", "NCDHW")
    y1 = lax.conv_general_dilated(x5, p["w1"], (1, 1, 2),
                                  [(0, 0), (0, 0), (0, 0)],
                                  dimension_numbers=dn,
                                  precision=lax.Precision.HIGHEST)
    y1 = y1 + p["b1"].reshape(1, -1, 1, 1, 1)
    y1 = _bn_relu(y1, p["g1"], p["bt1"], p["rm1"], p["rv1"])
    y3 = lax.conv_general_dilated(x5, p["w3"], (1, 1, 2),
                                  [(1, 1), (1, 1), (0, 0)],
                                  dimension_numbers=dn,
                                  precision=lax.Precision.HIGHEST)
    y3 = y3 + p["b3"].reshape(1, -1, 1, 1, 1)
    y3 = _bn_relu(y3, p["g3"], p["bt3"], p["rm3"], p["rv3"])

    x1 = jnp.stack([y3, y1], axis=1)                                  # (N,2,24,W,H,Cout)
    u = x1.sum(axis=1)
    s = u.mean(axis=(2, 3, 4), keepdims=True)                         # (N,24,1,1,1)
    r = p["wse"].shape[0]
    z = jnp.maximum(
        jnp.einsum("ncdhw,kc->nkdhw", s, p["wse"].reshape(r, OC),
                   precision=lax.Precision.HIGHEST)
        + p["bse"].reshape(1, -1, 1, 1, 1), 0.0)
    a = jnp.einsum("nkdhw,ok->nodhw", z, p["wex"].reshape(OC, r),
                   precision=lax.Precision.HIGHEST) + p["bex"].reshape(1, -1, 1, 1, 1)
    attn = jax.nn.softmax(jnp.stack([a, a], axis=1), axis=1)          # exact 0.5/0.5
    v = (x1 * attn).sum(axis=1)                                       # (N,24,W,H,Cout)
    return v.reshape(N, -1, H, W)


# --------------------------------- main ---------------------------------------
if __name__ == "__main__":
    batch, W, H, C = 2, 8, 8, 16          # small shapes; band = C = 16, reduction = 2
    band, reduction = C, 2

    key = jax.random.PRNGKey(0)
    ks = jax.random.split(key, 17)
    nrm = lambda k, shape, s=0.1: s * jax.random.normal(k, shape, dtype=jnp.float32)

    params = {
        "w1": nrm(ks[0], (24, 1, 1, 1, 7)),
        "b1": nrm(ks[1], (24,)),
        "w3": nrm(ks[2], (24, 1, 3, 3, 7)),
        "b3": nrm(ks[3], (24,)),
        "g1": 1.0 + nrm(ks[4], (24,)),
        "bt1": nrm(ks[5], (24,)),
        "rm1": nrm(ks[6], (24,)),
        "rv1": 0.5 + jnp.abs(nrm(ks[7], (24,))),
        "g3": 1.0 + nrm(ks[8], (24,)),
        "bt3": nrm(ks[9], (24,)),
        "rm3": nrm(ks[10], (24,)),
        "rv3": 0.5 + jnp.abs(nrm(ks[11], (24,))),
        "wse": nrm(ks[12], (band // reduction, 24, 1, 1, 1)),
        "bse": nrm(ks[13], (band // reduction,)),
        "wex": nrm(ks[14], (24, band // reduction, 1, 1, 1)),
        "bex": nrm(ks[15], (24,)),
    }
    x = jax.random.normal(ks[16], (batch, W, H, C), dtype=jnp.float32)

    fwd = jax.jit(adaptive_spectral_spatial_attention)   # jit so im2col fuses
    out = jax.block_until_ready(fwd(x, params))

    ref = reference_forward(x, params)
    assert out.shape == ref.shape, (out.shape, ref.shape)
    err = float(jnp.max(jnp.abs(out - ref)))
    # Single-pass bf16 MXU (f32 accumulation) vs f32-HIGHEST reference:
    # typical max-abs error ~1e-3..1e-2 at these magnitudes.
    if err > 2e-2:
        raise AssertionError(f"kernel mismatch vs reference, max abs err = {err}")

    print("KERNEL_OK")
</pallas_src>

<mosaic_0001>
module attributes {stable_mosaic.version = 11 : i64} {
  func.func @_assa_kernel(%arg0: i32, %arg1: i32, %arg2: memref<1x63x320xbf16, #tpu.memory_space<vmem>>, %arg3: memref<48x63xbf16, #tpu.memory_space<vmem>>, %arg4: memref<48x1xf32, #tpu.memory_space<vmem>>, %arg5: memref<1x24x320xf32, #tpu.memory_space<vmem>>) attributes {dimension_semantics = [#tpu.dimension_semantics<parallel>, #tpu.dimension_semantics<parallel>], iteration_bounds = array<i64: 2, 1>, scalar_prefetch = 0 : i64, scratch_operands = 0 : i64, tpu.core_type = #tpu.core_type<tc>, window_params = [{transform_indices = @transform_0, window_bounds = array<i64: 1, 63, 320>}, {pipeline_mode = #tpu.pipeline_mode<synchronous>, transform_indices = @transform_1, window_bounds = array<i64: 48, 63>}, {pipeline_mode = #tpu.pipeline_mode<synchronous>, transform_indices = @transform_2, window_bounds = array<i64: 48, 1>}, {transform_indices = @transform_3, window_bounds = array<i64: 1, 24, 320>}]} {
    %c0 = arith.constant 0 : index
    %c0_0 = arith.constant 0 : index
    %0 = vector.load %arg3[%c0, %c0_0] : memref<48x63xbf16, #tpu.memory_space<vmem>>, vector<48x63xbf16>
    %c0_1 = arith.constant 0 : index
    %c0_2 = arith.constant 0 : index
    %c0_3 = arith.constant 0 : index
    %1 = vector.load %arg2[%c0_1, %c0_2, %c0_3] : memref<1x63x320xbf16, #tpu.memory_space<vmem>>, vector<1x63x320xbf16>
    %2 = vector.shape_cast %1 : vector<1x63x320xbf16> to vector<63x320xbf16>
    %cst = arith.constant dense<0.000000e+00> : vector<48x320xf32>
    %3 = tpu.matmul %0, %2, %cst {dimension_numbers = #tpu.dot_dimension_numbers<[1], [0], [0], [1], [0, 0, 1, 1], [], []>} : vector<48x63xbf16>, vector<63x320xbf16>, vector<48x320xf32> -> vector<48x320xf32>
    %c0_4 = arith.constant 0 : index
    %c0_5 = arith.constant 0 : index
    %4 = vector.load %arg4[%c0_4, %c0_5] : memref<48x1xf32, #tpu.memory_space<vmem>>, vector<48x1xf32>
    %5 = vector.broadcast %4 : vector<48x1xf32> to vector<48x320xf32>
    %6 = arith.addf %3, %5 : vector<48x320xf32>
    %cst_6 = arith.constant 0.000000e+00 : f32
    %7 = vector.broadcast %cst_6 : f32 to vector<48x320xf32>
    %8 = arith.maximumf %6, %7 : vector<48x320xf32>
    %9 = vector.extract_strided_slice %8 {offsets = [0, 0], sizes = [24, 320], strides = [1, 1]} : vector<48x320xf32> to vector<24x320xf32>
    %10 = vector.extract_strided_slice %8 {offsets = [24, 0], sizes = [24, 320], strides = [1, 1]} : vector<48x320xf32> to vector<24x320xf32>
    %11 = arith.addf %9, %10 : vector<24x320xf32>
    %c0_7 = arith.constant 0 : index
    %c0_8 = arith.constant 0 : index
    %c0_9 = arith.constant 0 : index
    %12 = vector.load %arg5[%c0_7, %c0_8, %c0_9] : memref<1x24x320xf32, #tpu.memory_space<vmem>>, vector<1x24x320xf32>
    %13 = vector.shape_cast %12 : vector<1x24x320xf32> to vector<24x320xf32>
    %14 = vector.shape_cast %11 : vector<24x320xf32> to vector<1x24x320xf32>
    tpu.vector_store %arg5[%c0_7, %c0_8, %c0_9], %14 {strides = array<i32>} : memref<1x24x320xf32, #tpu.memory_space<vmem>>, vector<1x24x320xf32>,
    return
  }
  func.func @transform_0(%arg0: i32, %arg1: i32) -> (i32, i32, i32) {
    %c0_i32 = arith.constant 0 : i32
    %c0_i32_0 = arith.constant 0 : i32
    return %arg0, %c0_i32, %arg1 : i32, i32, i32
  }
  func.func @transform_1(%arg0: i32, %arg1: i32) -> (i32, i32) {
    %c0_i32 = arith.constant 0 : i32
    %c0_i32_0 = arith.constant 0 : i32
    %c0_i32_1 = arith.constant 0 : i32
    return %c0_i32, %c0_i32_0 : i32, i32
  }
  func.func @transform_2(%arg0: i32, %arg1: i32) -> (i32, i32) {
    %c0_i32 = arith.constant 0 : i32
    %c0_i32_0 = arith.constant 0 : i32
    %c0_i32_1 = arith.constant 0 : i32
    return %c0_i32, %c0_i32_0 : i32, i32
  }
  func.func @transform_3(%arg0: i32, %arg1: i32) -> (i32, i32, i32) {
    %c0_i32 = arith.constant 0 : i32
    %c0_i32_0 = arith.constant 0 : i32
    return %arg0, %c0_i32, %arg1 : i32, i32, i32
  }
}

</mosaic_0001>

<bundles_post_ra>
// kernel: adaptive_spectral_spatial_attention.1
= control target key start
LH: loop header
LB: loop body
LE: loop exit
PB: predicated region body
PF: predicated region fallthrough
CT: control target
= control target key end

     0   :  { %s768_s12 = smov 0   ;;  %s770_s13 = smov 0   ;;  %s875_s0 = inlined_call_operand.vmem [shape: bf16[2,63,320], index: 0, kind: input, shape index: {}]   ;;  %s876_s1 = inlined_call_operand.vmem [shape: bf16[48,63], index: 1, kind: input, shape index: {}]   ;;  %s877_s2 = inlined_call_operand.vmem [shape: f32[48,1], index: 2, kind: input, shape index: {}]   ;;  %s878_s3 = inlined_call_operand.vmem [shape: f32[2,24,320], index: 3, kind: output, shape index: {}]  }
   0x1   :  { %s772_s14 = smov 0  }
   0x2 LB: > { %s25_s15 = sadd.s32 1, %s738_s13  ;;  %p616_p0 = scmp.ge.s32.totalorder %s742_s14, 1  ;;  %s742_s14 = sphi %s772_s14, %s13_s14   ;;  %s738_s13 = sphi %s770_s13, %s880_s13   ;;  %s734_s12 = sphi %s768_s12, %s879_s12  }
   0x3   : > { %p27_p1 = scmp.ge.s32.totalorder %s25_s15, 2  ;;  %p158_p2 = scmp.lt.s32.totalorder %s742_s14, 3 }
   0x5   : > { %s882_s15 = smov (%p27_p1, %s25_s15), 0  ;;  %p159_p3 = pnand %p616_p0, %p158_p2 }
   0x6   : > { %p191_p4 = scmp.lt.s32.totalorder (!%p159_p3), %s734_s12, 1  ;;  %v744_v0 = vmov (!%p159_p3), 0.0   ;;  %vm745_vm0 = vmmov (!%p159_p3), 0   ;;  %v746_v1 = vmov (!%p159_p3), 0   ;;  %v233_v2 = vld [vmem:[%s877_s2] sm:$0xff] (!%p159_p3)  ;;  %v235_v3 = vld [vmem:[%s877_s2 + $0x10] sm:$0xff] (!%p159_p3) }
   0x7   : > { %162 = sbr.rel (%p159_p3) target bundleno = 273 (0x111), region = 32  ;;  %649 = vmatprep.subr.bf16.mxu1 (!%p159_p3), %v744_v0  ;;  %657 = vmatprep.mubr.msk.bf16.mxu1 (!%p159_p3), %vm745_vm0, %v744_v0  ;;  %vm355_vm1 = vcmask (!%p159_p3), 1046528   ;;  %v234_v4 = vld [vmem:[%s877_s2 + $0x8] sm:$0xff] (!%p159_p3)  ;;  %v236_v5 = vld [vmem:[%s877_s2 + $0x18] sm:$0xff] (!%p159_p3)  ;;  %v237_v8 = vld [vmem:[%s877_s2 + $0x20] sm:$0xff] (!%p159_p3)  ;;  %vm356_vm2 = vcmask (!%p159_p3), 1047552  }
   0x8   : > { %400 = vmatprep.mubr.bf16.mxu0 (!%p159_p3), %v746_v1  ;;  %699 = vset.pattern.permute.xlu0 (!%p159_p3), %v746_v1  ;;  %v747_v10 = vmov (!%p159_p3), 65535   ;;  %v238_v12 = vld [vmem:[%s877_s2 + $0x28] sm:$0xff] (!%p159_p3)  ;;  %v717_v26 = vld [vmem:[%s876_s1] sm:$0xff] (!%p159_p3)   ;;  %vm345_vm3 = vcmask (!%p159_p3), 515072   ;;  %v719_v28 = vld [vmem:[%s876_s1 + $0x10] sm:$0xff] (!%p159_p3)   ;;  %vm517_vm4 = vcmask (!%p159_p3), 523264  }
   0x9   : > { %700 = vset.pattern.permute.xlu1 (!%p159_p3), %v746_v1  ;;  %241 = vperm.xlu0 (!%p159_p3), %699, %v233_v2   ;;  %v357_v11 = vsel (!%p159_p3), %vm355_vm1, 4294967295, %v747_v10  ;;  %v718_v27 = vld [vmem:[%s876_s1 + $0x8] sm:$0xff] (!%p159_p3)  }
   0xa   : > { %251 = vperm.xlu1 (!%p159_p3), %700, %v235_v3   ;;  %v358_v17 = vsel (!%p159_p3), %vm356_vm2, %v357_v11, 0 }
   0xd   : > { %246 = vperm.xlu0 (!%p159_p3), %699, %v234_v4  }
   0xe   : > { %s884_s12 = smov (!%p191_p4, %s734_s12), 1  ;;  %256 = vperm.xlu1 %700, %v236_v5  }
   0xf   : > { %s669_s16 = smul.u32 96, %s884_s12 }
  0x10   : > { %s670_s11 = smul.u32 72, %s884_s12 }
  0x11   : > { %s804_s23 = scalar_lea.vmem %s875_s0, %s669_s16  ;;  %261 = vperm.xlu0 %699, %v237_v8  }
  0x12   : > { %v701_v6 = vld [vmem:[%s804_s23 + $0x4] ss:$12 sps:$4 sm:$0xff]   ;;  %v703_v7 = vld [vmem:[%s804_s23 + $0x8] ss:$12 sps:$4 sm:$0xff]   ;;  %v704_v9 = vld [vmem:[%s804_s23] ss:$12 sps:$4 sm:$0xff]   ;;  %266 = vperm.xlu1 %700, %v238_v12   ;;  %s852_s18 = scalar_lea.vmem %s878_s3, %s670_s11 }
  0x13   : > { %368 = vmatprep.subr.bf16.mxu0 %v701_v6  ;;  %650 = vmatpush3.bf16.msra.mxu1 %v703_v7  ;;  %v705_v13 = vld [vmem:[%s804_s23 + $0x1c] ss:$12 sps:$4 sm:$0xff]   ;;  %v707_v14 = vld [vmem:[%s804_s23 + $0x20] ss:$12 sps:$4 sm:$0xff]   ;;  %v708_v15 = vld [vmem:[%s804_s23 + $0x18] ss:$12 sps:$4 sm:$0xff]  }
  0x14   : > { %369 = vmatpush1.bf16.msra.mxu0 %v704_v9  ;;  %651 = vmatprep.subr.bf16.mxu1 %v744_v0  ;;  %v709_v16 = vld [vmem:[%s804_s23 + $0x34] ss:$12 sps:$4 sm:$0xff]   ;;  %v711_v18 = vld [vmem:[%s804_s23 + $0x38] ss:$12 sps:$4 sm:$0xff]   ;;  %v712_v19 = vld [vmem:[%s804_s23 + $0x30] ss:$12 sps:$4 sm:$0xff]  }
  0x15   : > { %370 = vmatprep.subr.bf16.mxu0 %v705_v13  ;;  %v713_v20 = vld [vmem:[%s804_s23 + $0x4c] ss:$12 sps:$4 sm:$0xff]   ;;  %v715_v21 = vld [vmem:[%s804_s23 + $0x50] ss:$12 sps:$4 sm:$0xff]   ;;  %v716_v23 = vld [vmem:[%s804_s23 + $0x48] ss:$12 sps:$4 sm:$0xff]  }
  0x16   : > { %v363_v22 = vand.u32 %v713_v20, %v358_v17  ;;  %v366_v24 = vand.u32 %v715_v21, %v358_v17  ;;  %v360_v25 = vand.u32 %v716_v23, %v358_v17 }
  0x17   : > { %652 = vmatpush3.bf16.msra.mxu1 %v707_v14 }
  0x18   : > { %371 = vmatpush1.bf16.msra.mxu0 %v708_v15  ;;  %653 = vmatprep.subr.bf16.mxu1 %v744_v0 }
  0x19   : > { %372 = vmatprep.subr.bf16.mxu0 %v709_v16 }
  0x1b   : > { %654 = vmatpush3.bf16.msra.mxu1 %v711_v18 }
  0x1c   : > { %373 = vmatpush1.bf16.msra.mxu0 %v712_v19  ;;  %655 = vmatprep.subr.bf16.mxu1 %v744_v0 }
  0x1d   : > { %374 = vmatprep.subr.bf16.mxu0 %v363_v22 }
  0x1f   : > { %656 = vmatpush3.bf16.msra.mxu1 %v366_v24 }
  0x20   : > { %375 = vmatpush1.bf16.msra.mxu0 %v360_v25 }
  0x22   : > { %658 = vmatmul.mubr.msk.bf16.vlgmr.msra.gmra.mrb[0].mxu1 %vm345_vm3, %v717_v26 }
  0x23   : > { %634 = vmatmul.mubr.msk.bf16.vlgmr.msra.gmra.mrb[0].mxu0 %vm345_vm3, %v717_v26  ;;  %661 = vmatprep.mubr.msk.bf16.mxu1 %vm745_vm0, %v744_v0 }
  0x24   : > { %410 = vmatprep.mubr.bf16.mxu0 %v746_v1 }
  0x2a   : > { %662 = vmatmul.mubr.msk.bf16.gmra.mrb[4].mxu1 %vm345_vm3, %v718_v27 }
  0x2b   : > { %635 = vmatmul.mubr.msk.bf16.gmra.mrb[4].mxu0 %vm345_vm3, %v718_v27  ;;  %665 = vmatprep.mubr.msk.bf16.mxu1 %vm745_vm0, %v744_v0 }
  0x2c   : > { %420 = vmatprep.mubr.bf16.mxu0 %v746_v1 }
  0x32   : > { %666 = vmatmul.mubr.msk.bf16.gmra.mrb[8].mxu1 %vm345_vm3, %v719_v28 }
  0x33   : > { %636 = vmatmul.mubr.msk.bf16.gmra.mrb[8].mxu0 %vm345_vm3, %v719_v28 }
  0x88   : > { %v242_v29 = vpop.permute.xlu0 %241 }
  0x89   : > { %v252_v31 = vpop.permute.xlu1 %251 }
  0x8c   : > { %v247_v39 = vpop.permute.xlu0 %246 }
  0x8d   : > { %v257_v40 = vpop.permute.xlu1 %256 }
  0x90   : > { %v262_v63 = vpop.permute.xlu0 %261 }
  0x91   : > { %v267_v4 = vpop.permute.xlu1 %266 }
  0xf5   : > { %v465_v30 = vpop.f32.mrb[0].mxu1 }
  0xf6   : > { %v402_v32 = vpop.f32.mrb[0].mxu0  ;;  %v659_v33 = vpop.f32.mrb[1].mxu1  ;;  %v466_v42 = vadd.f32 %v465_v30, %v242_v29 }
  0xf7   : > { %v404_v34 = vpop.f32.mrb[1].mxu0  ;;  %v468_v35 = vpop.f32.mrb[2].mxu1  ;;  %v403_v45 = vadd.f32 %v402_v32, %v242_v29 }
  0xf8   : > { %v406_v36 = vpop.f32.mrb[2].mxu0  ;;  %v660_v37 = vpop.f32.mrb[3].mxu1  ;;  %v405_v48 = vadd.f32 %v404_v34, %v242_v29  ;;  %v490_v54 = vmax.f32 %v466_v42, 0.0  ;;  %v469_v58 = vadd.f32 %v468_v35, %v247_v39 }
  0xf9   : > { %v408_v38 = vpop.f32.mrb[3].mxu0  ;;  %v488_v57 = vmax.f32 %v403_v45, 0.0  ;;  %v407_v59 = vadd.f32 %v406_v36, %v247_v39 }
  0xfa   : > { %v489_v61 = vmax.f32 %v405_v48, 0.0  ;;  %v409_v1 = vadd.f32 %v408_v38, %v247_v39  ;;  %v493_v10 = vmax.f32 %v469_v58, 0.0 }
  0xfb   : > { %v491_v11 = vmax.f32 %v407_v59, 0.0 }
  0xfc   : > { %v492_v22 = vmax.f32 %v409_v1, 0.0 }
  0xfd   : > { %v473_v41 = vpop.f32.mrb[4].mxu1 }
  0xfe   : > { %v412_v43 = vpop.f32.mrb[4].mxu0  ;;  %v663_v44 = vpop.f32.mrb[5].mxu1  ;;  %v474_v2 = vadd.f32 %v473_v41, %v252_v31 }
  0xff   : > { %v414_v46 = vpop.f32.mrb[5].mxu0  ;;  %v476_v47 = vpop.f32.mrb[6].mxu1  ;;  %v413_v12 = vadd.f32 %v412_v43, %v252_v31 }
 0x100   : > { %v477_v49 = vadd.f32 %v476_v47, %v257_v40  ;;  %v416_v50 = vpop.f32.mrb[6].mxu0  ;;  %v664_v51 = vpop.f32.mrb[7].mxu1  ;;  %v415_v16 = vadd.f32 %v414_v46, %v252_v31  ;;  %v496_v23 = vmax.f32 %v474_v2, 0.0 }
 0x101   : > { %v417_v52 = vadd.f32 %v416_v50, %v257_v40  ;;  %v418_v53 = vpop.f32.mrb[7].mxu0  ;;  %v494_v31 = vmax.f32 %v413_v12, 0.0 }
 0x102   : > { %v499_v55 = vmax.f32 %v477_v49, 0.0  ;;  %v419_v56 = vadd.f32 %v418_v53, %v257_v40  ;;  %v495_v34 = vmax.f32 %v415_v16, 0.0 }
 0x103   : > { %v497_v60 = vmax.f32 %v417_v52, 0.0 }
 0x104   : > { %v508_v62 = vadd.f32 %v499_v55, %v490_v54  ;;  %v498_v0 = vmax.f32 %v419_v56, 0.0 }
 0x105   : > { %v506_v3 = vadd.f32 %v497_v60, %v488_v57  ;;  %v481_v5 = vpop.f32.mrb[8].mxu1 }
 0x106   : > { %518 = vst.msk [vmem:[%s852_s18 + $0x10] sm:$0xff] %vm517_vm4, %v508_v62  ;;  %v507_v6 = vadd.f32 %v498_v0, %v489_v61  ;;  %v482_v7 = vadd.f32 %v481_v5, %v262_v63  ;;  %v422_v8 = vpop.f32.mrb[8].mxu0  ;;  %v667_v9 = vpop.f32.mrb[9].mxu1 }
 0x107   : > { %515 = vst [vmem:[%s852_s18] sm:$0xff] %v506_v3  ;;  %v423_v13 = vadd.f32 %v422_v8, %v262_v63  ;;  %v424_v14 = vpop.f32.mrb[9].mxu0  ;;  %v484_v15 = vpop.f32.mrb[10].mxu1 }
 0x108   : > { %516 = vst [vmem:[%s852_s18 + $0x8] sm:$0xff] %v507_v6  ;;  %v502_v17 = vmax.f32 %v482_v7, 0.0  ;;  %v425_v18 = vadd.f32 %v424_v14, %v262_v63  ;;  %v485_v19 = vadd.f32 %v484_v15, %v267_v4  ;;  %v426_v20 = vpop.f32.mrb[10].mxu0  ;;  %v668_v21 = vpop.f32.mrb[11].mxu1 }
 0x109   : > { %v500_v24 = vmax.f32 %v423_v13, 0.0  ;;  %v427_v25 = vadd.f32 %v426_v20, %v267_v4  ;;  %v428_v26 = vpop.f32.mrb[11].mxu0 }
 0x10a   : > { %v511_v27 = vadd.f32 %v502_v17, %v493_v10  ;;  %v501_v28 = vmax.f32 %v425_v18, 0.0  ;;  %v505_v29 = vmax.f32 %v485_v19, 0.0  ;;  %v429_v30 = vadd.f32 %v428_v26, %v267_v4 }
 0x10b   : > { %v509_v32 = vadd.f32 %v500_v24, %v491_v11  ;;  %v503_v33 = vmax.f32 %v427_v25, 0.0 }
 0x10c   : > { %521 = vst.msk [vmem:[%s852_s18 + $0x28] sm:$0xff] %vm517_vm4, %v511_v27  ;;  %v510_v35 = vadd.f32 %v501_v28, %v492_v22  ;;  %v514_v36 = vadd.f32 %v505_v29, %v496_v23  ;;  %v504_v37 = vmax.f32 %v429_v30, 0.0 }
 0x10d   : > { %519 = vst [vmem:[%s852_s18 + $0x18] sm:$0xff] %v509_v32  ;;  %v512_v38 = vadd.f32 %v503_v33, %v494_v31 }
 0x10e   : > { %520 = vst [vmem:[%s852_s18 + $0x20] sm:$0xff] %v510_v35  ;;  %524 = vst.msk [vmem:[%s852_s18 + $0x40] sm:$0xff] %vm517_vm4, %v514_v36  ;;  %v513_v39 = vadd.f32 %v504_v37, %v495_v34 }
 0x10f   : > { %522 = vst [vmem:[%s852_s18 + $0x30] sm:$0xff] %v512_v38 }
 0x110   : > { %523 = vst [vmem:[%s852_s18 + $0x38] sm:$0xff] %v513_v39 }
 0x111 PF: > { %s13_s14 = sadd.s32 1, %s742_s14   ;;  %s879_s12 = smov %s738_s13 }
 0x112   : > { %p10_p5 = scmp.ge.s32.totalorder %s13_s14, 4   ;;  %s880_s13 = smov %s882_s15 }
 0x114   :  { %12 = sbr.rel (!%p10_p5) target bundleno = 2 (0x2), region = 62 }

</bundles_post_ra>
